<compile_context>
chip_gen: v7x
topology: tpu7x:2x2x1
jax: 0.10.0
libtpu: 0.0.40
codegen_flags: <defaults>
</compile_context>

<pallas_src>
import jax
import jax.numpy as jnp
from jax import lax
from jax.experimental import pallas as pl
from jax.experimental.pallas import tpu as pltpu


def _round_up(x, m):
    return (x + m - 1) // m * m


def _pow2_floor(x):
    return 1 << (max(int(x), 1).bit_length() - 1)


def _vmem_capacity_bytes():
    try:
        return int(pltpu.get_tpu_info().vmem_capacity_bytes)
    except Exception:
        return 64 * 1024 * 1024          # conservative default (v7x-sized VMEM)


def _num_tensorcores():
    # Best-effort TensorCore count (2 on v7x, 1 on v5e/v6e); default to 1.
    try:
        info = pltpu.get_tpu_info()
        for attr in ("num_cores", "core_count", "num_tensorcores"):
            v = getattr(info, attr, None)
            if v:
                return max(1, int(v))
    except Exception:
        pass
    try:
        return max(1, int(getattr(jax.devices()[0], "num_cores", 1) or 1))
    except Exception:
        return 1


# ---------------------------------------------------------------------------
# Fast path: VMEM-resident table -> one-hot MXU matmul per output tile.
# ---------------------------------------------------------------------------
def _onehot_gather_kernel(idx_ref, table_ref, out_ref):
    # idx_ref  : VMEM (tile, 1) int32
    # table_ref: VMEM (num_nodes, h_dim)   (same block every step -> loaded once)
    # out_ref  : VMEM (tile, h_dim)
    tile = out_ref.shape[0]
    num_nodes = table_ref.shape[0]
    idx = idx_ref[...]                                          # (tile, 1)
    node_ids = lax.broadcasted_iota(jnp.int32, (tile, num_nodes), 1)
    onehot = (node_ids == idx).astype(table_ref.dtype)          # (tile, num_nodes)
    out_ref[...] = jnp.dot(
        onehot, table_ref[...],
        preferred_element_type=jnp.float32,
        precision=lax.Precision.HIGHEST,       # keep f32 rows (bit-)accurate
    ).astype(out_ref.dtype)


# ---------------------------------------------------------------------------
# Slow path: HBM-resident table, manual row DMAs straight into the out block.
# ---------------------------------------------------------------------------
def _make_dma_gather_kernel(nbuf):
    def kernel(idx_ref, table_hbm, out_ref, sem):
        # idx_ref  : SMEM (n_pad,) int32    (scalar-prefetched row ids)
        # table_hbm: HBM  (num_nodes, h_dim) raw ref (memory_space=pl.ANY)
        # out_ref  : VMEM (tile, h_dim)     (DMA destination; auto writeback)
        # sem      : DMA semaphores (nbuf,)
        tile = out_ref.shape[0]
        base = pl.program_id(0) * tile

        def row_copy(dst_row, src_row, slot):
            return pltpu.make_async_copy(
                table_hbm.at[pl.ds(src_row, 1), :],    # (1, h_dim) HBM row
                out_ref.at[pl.ds(dst_row, 1), :],      # (1, h_dim) output row
                sem.at[slot],
            )

        # Prime: keep `nbuf` row fetches in flight (no rowbuf staging).
        for j in range(nbuf):                          # static, unrolled
            row_copy(j, idx_ref[base + j], j).start()

        def body(j, carry):
            slot = j & (nbuf - 1)                      # nbuf is a power of two
            # Pre-read SMEM scalars BEFORE the wait (.wait() breaks sst->sld
            # forwarding; reading after it stalls the scalar unit per row).
            row_j = idx_ref[base + j]
            nxt = j + nbuf
            has_next = nxt < tile
            row_next = idx_ref[base + jnp.where(has_next, nxt, j)]

            # Wait on row j using the same descriptor that was started.
            row_copy(j, row_j, slot).wait()

            # Refill this slot with row j + nbuf (keeps nbuf DMAs outstanding).
            @pl.when(has_next)
            def _():
                row_copy(nxt, row_next, slot).start()

            return carry

        # Every row is waited on inside the loop, so all gather DMAs complete
        # before Pallas writes the output block back to HBM.
        lax.fori_loop(0, tile, body, 0)
        # TODO(synk): dedup / coalesce contiguous index runs into multi-row
        # DMAs; and for very large n, move indices to per-tile SMEM blocks
        # instead of whole-array scalar prefetch to bound SMEM usage.

    return kernel


def embedding_lookup(table, indices, *, tile_rows=512, nbuf=16, force_dma=False):
    """Gather rows of `table` at `indices` with a Pallas TPU kernel."""
    indices = jnp.asarray(indices, jnp.int32).reshape(-1)
    n = int(indices.shape[0])
    num_nodes, h_dim = table.shape
    itemsize = jnp.dtype(table.dtype).itemsize
    if n == 0:
        return jnp.zeros((0, h_dim), table.dtype)

    # torch.nn.Embedding raises on out-of-range ids; clamp instead of OOB DMA.
    indices = jnp.clip(indices, 0, num_nodes - 1)

    vmem_cap = _vmem_capacity_bytes()            # 64 MiB on v7x, 128 MiB v5e/v6e
    budget = (vmem_cap * 3) // 4
    table_bytes = num_nodes * h_dim * itemsize

    # ---- choose path + tile size from actual VMEM usage ---------------------
    per_row_fast = 2 * h_dim * itemsize + 2 * num_nodes * 4 + 2 * 4
    per_row_slow = 2 * h_dim * itemsize          # double-buffered output block
    use_fast = (
        not force_dma
        and num_nodes <= 8192                    # keep the one-hot matmul cheap
        and 2 * table_bytes + 8 * per_row_fast <= budget
    )
    if use_fast:
        tile = (budget - 2 * table_bytes) // per_row_fast
    else:
        tile = (budget // 2) // per_row_slow
    tile = max(8, min(tile_rows, tile) // 8 * 8)
    tile = min(tile, _round_up(n, 8))

    # Keep all TensorCores busy (v7x has 2) when n would otherwise be 1 tile.
    cores = _num_tensorcores()
    if cores > 1 and _round_up(n, tile) // tile < cores and n > 8:
        tile = min(tile, max(8, _round_up((n + cores - 1) // cores, 8)))

    n_pad = _round_up(n, tile)
    num_tiles = n_pad // tile
    if n_pad != n:
        indices = jnp.concatenate([indices, jnp.zeros((n_pad - n,), jnp.int32)])

    out_shape = jax.ShapeDtypeStruct((n_pad, h_dim), table.dtype)

    if use_fast:
        need = 2 * table_bytes + tile * per_row_fast + (1 << 20)
        vmem_limit = int(min(max(need, 16 << 20), (vmem_cap * 9) // 10))
        cost = pl.CostEstimate(
            flops=2 * n_pad * num_nodes * h_dim,
            transcendentals=0,
            bytes_accessed=table_bytes + 2 * n_pad * h_dim * itemsize + n_pad * 4,
        )
        out = pl.pallas_call(
            _onehot_gather_kernel,
            out_shape=out_shape,
            grid=(num_tiles,),
            in_specs=[
                pl.BlockSpec((tile, 1), lambda i: (i, 0)),             # indices
                pl.BlockSpec((num_nodes, h_dim), lambda i: (0, 0)),    # table, resident
            ],
            out_specs=pl.BlockSpec((tile, h_dim), lambda i: (i, 0)),
            compiler_params=pltpu.CompilerParams(
                dimension_semantics=("parallel",),
                vmem_limit_bytes=vmem_limit,
            ),
            cost_estimate=cost,
        )(indices.reshape(n_pad, 1), table)
    else:
        nbuf = _pow2_floor(max(1, min(nbuf, tile)))
        need = tile * per_row_slow + (1 << 20)
        vmem_limit = int(min(max(need, 16 << 20), (vmem_cap * 9) // 10))
        cost = pl.CostEstimate(
            flops=0,
            transcendentals=0,
            bytes_accessed=2 * n_pad * h_dim * itemsize + n_pad * 4,
        )
        out = pl.pallas_call(
            _make_dma_gather_kernel(nbuf),
            out_shape=out_shape,
            grid_spec=pltpu.PrefetchScalarGridSpec(
                num_scalar_prefetch=1,                      # indices -> SMEM
                grid=(num_tiles,),
                in_specs=[pl.BlockSpec(memory_space=pl.ANY)],   # table stays in HBM
                out_specs=pl.BlockSpec((tile, h_dim), lambda i, idx: (i, 0)),
                scratch_shapes=[pltpu.SemaphoreType.DMA((nbuf,))],
            ),
            compiler_params=pltpu.CompilerParams(
                dimension_semantics=("parallel",),
                vmem_limit_bytes=vmem_limit,
            ),
            cost_estimate=cost,
        )(indices, table)

    return out[:n] if n_pad != n else out


class EmbeddingLayer:
    """JAX/Pallas port of the PyTorch EmbeddingLayer (forward = embedding(h.squeeze()))."""

    def __init__(self, num_nodes, h_dim, key):
        # torch.nn.Embedding default init: weight ~ N(0, 1)
        self.weight = jax.random.normal(key, (num_nodes, h_dim), dtype=jnp.float32)

    def forward(self, g, h, r, norm):
        # g, r, norm are unused by the reference forward pass.
        idx = jnp.reshape(jnp.squeeze(h), (-1,))
        return embedding_lookup(self.weight, idx)


if __name__ == "__main__":
    key = jax.random.PRNGKey(0)
    k_w, k_idx = jax.random.split(key)

    num_nodes, h_dim = 32, 128
    seq = 10   # deliberately not a multiple of 8 to exercise tile padding

    layer = EmbeddingLayer(num_nodes, h_dim, k_w)

    # h is an index tensor with a trailing singleton dim (squeezed in forward)
    h = jax.random.randint(k_idx, (seq, 1), 0, num_nodes, dtype=jnp.int32)
    g, r, norm = None, None, None   # unused by the forward pass

    ref = jnp.take(layer.weight, jnp.squeeze(h), axis=0)

    # Fast path (32x128 f32 table trivially fits in VMEM -> one-hot MXU gather)
    out = layer.forward(g, h, r, norm)
    out = jax.block_until_ready(out)
    assert out.shape == (seq, h_dim)
    assert jnp.allclose(out, ref, atol=1e-5, rtol=1e-5), "fast-path gather mismatch"

    # Also exercise the HBM-resident manual-DMA gather path (used for tables
    # too large to pin in VMEM).
    out_dma = embedding_lookup(layer.weight, jnp.squeeze(h), force_dma=True)
    out_dma = jax.block_until_ready(out_dma)
    assert out_dma.shape == (seq, h_dim)
    assert jnp.allclose(out_dma, ref, atol=1e-5, rtol=1e-5), "DMA-path gather mismatch"

    print("KERNEL_OK")
</pallas_src>

<mosaic_0001>
module attributes {stable_mosaic.version = 11 : i64} {
  func.func @_onehot_gather_kernel(%arg0: i32, %arg1: memref<16x1xi32, #tpu.memory_space<vmem>>, %arg2: memref<32x128xf32, #tpu.memory_space<vmem>>, %arg3: memref<16x128xf32, #tpu.memory_space<vmem>>) attributes {dimension_semantics = [#tpu.dimension_semantics<parallel>], iteration_bounds = array<i64: 1>, scalar_prefetch = 0 : i64, scratch_operands = 0 : i64, tpu.core_type = #tpu.core_type<tc>, window_params = [{transform_indices = @transform_0, window_bounds = array<i64: 16, 1>}, {pipeline_mode = #tpu.pipeline_mode<synchronous>, transform_indices = @transform_1, window_bounds = array<i64: 32, 128>}, {transform_indices = @transform_2, window_bounds = array<i64: 16, 128>}]} {
    %c0 = arith.constant 0 : index
    %c0_0 = arith.constant 0 : index
    %0 = vector.load %arg1[%c0, %c0_0] : memref<16x1xi32, #tpu.memory_space<vmem>>, vector<16x1xi32>
    %1 = tpu.iota {dimensions = array<i32: 1>} : vector<16x32xi32>
    %2 = vector.broadcast %0 : vector<16x1xi32> to vector<16x32xi32>
    %3 = arith.cmpi eq, %1, %2 : vector<16x32xi32>
    %4 = arith.extui %3 : vector<16x32xi1> to vector<16x32xi32>
    %5 = arith.sitofp %4 : vector<16x32xi32> to vector<16x32xf32>
    %c0_1 = arith.constant 0 : index
    %c0_2 = arith.constant 0 : index
    %6 = vector.load %arg2[%c0_1, %c0_2] : memref<32x128xf32, #tpu.memory_space<vmem>>, vector<32x128xf32>
    %cst = arith.constant dense<0.000000e+00> : vector<16x128xf32>
    %7 = tpu.matmul %5, %6, %cst {dimension_numbers = #tpu.dot_dimension_numbers<[1], [0], [0], [1], [0, 0, 1, 1], [], []>, precision = #tpu.contract_precision<fp32>} : vector<16x32xf32>, vector<32x128xf32>, vector<16x128xf32> -> vector<16x128xf32>
    %c0_3 = arith.constant 0 : index
    %c0_4 = arith.constant 0 : index
    %8 = vector.load %arg3[%c0_3, %c0_4] : memref<16x128xf32, #tpu.memory_space<vmem>>, vector<16x128xf32>
    tpu.vector_store %arg3[%c0_3, %c0_4], %7 {strides = array<i32>} : memref<16x128xf32, #tpu.memory_space<vmem>>, vector<16x128xf32>,
    return
  }
  func.func @transform_0(%arg0: i32) -> (i32, i32) {
    %c0_i32 = arith.constant 0 : i32
    %c0_i32_0 = arith.constant 0 : i32
    return %arg0, %c0_i32 : i32, i32
  }
  func.func @transform_1(%arg0: i32) -> (i32, i32) {
    %c0_i32 = arith.constant 0 : i32
    %c0_i32_0 = arith.constant 0 : i32
    %c0_i32_1 = arith.constant 0 : i32
    return %c0_i32, %c0_i32_0 : i32, i32
  }
  func.func @transform_2(%arg0: i32) -> (i32, i32) {
    %c0_i32 = arith.constant 0 : i32
    %c0_i32_0 = arith.constant 0 : i32
    return %arg0, %c0_i32 : i32, i32
  }
}

</mosaic_0001>

<bundles_post_ra>
// kernel: tpu_custom_call.1
= control target key start
LH: loop header
LB: loop body
LE: loop exit
PB: predicated region body
PF: predicated region fallthrough
CT: control target
= control target key end

     0   :  { %7 = vsyncpa [#allocation3], 0  ;;  %s904_s0 = inlined_call_operand.vmem [shape: s32[16,1], index: 0, kind: input, shape index: {}]   ;;  %s905_s1 = inlined_call_operand.hbm [shape: f32[32,128], index: 1, kind: input, shape index: {}]   ;;  %s906_s2 = inlined_call_operand.hbm [shape: f32[16,128], index: 2, kind: output, shape index: {}]  }
   0x1   :  { %8 = vsyncpa [#allocation4], 0  ;;  %s823_s9 = smov [#allocation2]   ;;  %s775_s13 = scalar_lea.hbm %s905_s1, 512 }
   0x2   :  { %s16_s10 = sshll.u32 %s823_s9, 4  ;;  %p776_p0 = scmp.ne.s32.totalorder %s905_s1, %s775_s13  ;;  %s17_s10 = int_to_ptr.vmem [resolvable:$true] %s16_s10 }
   0x3   :  { %p779_p1 = scmp.lt.u32.totalorder %s775_s13, %s905_s1 }
   0x5   :  { %p781_p2 = pnand %p779_p1, %p776_p0 }
   0x7   :  { %784 = shalt.err (!%p781_p2)
}
   0x8   :  { %s785_s18 = scalar_lea.vmem %s17_s10, 512  ;;  %p790_p4 = scmp.lt.s32.totalorder %s17_s10, %s17_s10 }
   0x9   :  { %p786_p3 = scmp.ne.s32.totalorder %s17_s10, %s785_s18  ;;  %p791_p5 = scmp.lt.s32.totalorder %s785_s18, %s785_s18 }
   0xb   :  { %p792_p6 = por %p791_p5, %p790_p4 }
   0xd   :  { %p793_p7 = pnand %p792_p6, %p786_p3 }
   0xf   :  { %796 = shalt.err (!%p793_p7)
}
  0x10   :  { %s824_s19 = smov 128   ;;  %s825_s20 = smov 8  }
  0x11   :  { %22 = dma.hbm_to_vmem [thread:$0]  %s905_s1, 512, %s17_s10, [#allocation3], %s824_s19, %s824_s19, %s825_s20  }
  0x12   :  { %819 = dma.done.wait [#allocation3], 512  }
  0x13   :  { %820 = vsyncadd [#allocation3], 4294966784  ;;  %v826_v0 = vmov 0   ;;  %v26_v1 = vld [vmem:[%s904_s0] sm:$0xff]  ;;  %v43_v3 = vld [vmem:[#allocation2 + $0x8] sm:$0xff]  ;;  %v28_v35 = vlaneseq  ;;  %vm46_vm0 = vcmask 261120  }
  0x14   :  { %774 = vset.pattern.permute.xlu0 %v826_v0  ;;  %v42_v2 = vld [vmem:[#allocation2] sm:$0xff]  ;;  %v27_v5 = vld [vmem:[%s904_s0 + $0x8] sm:$0xff]  ;;  %v57_v6 = vand.u32 4294901760, %v43_v3  ;;  %v44_v7 = vld [vmem:[#allocation2 + $0x10] sm:$0xff]  ;;  %v827_v38 = vmov 0.0   ;;  %s828_s0 = smov [#allocation5]  }
  0x15   :  { %31 = vperm.xlu0 %774, %v26_v1   ;;  %v54_v4 = vand.u32 4294901760, %v42_v2  ;;  %v45_v8 = vld [vmem:[#allocation2 + $0x18] sm:$0xff]  ;;  %v60_v10 = vand.u32 4294901760, %v44_v7  ;;  %v29_v36 = vand.u32 127, %v28_v35  ;;  %s588_s1 = sshll.u32 %s828_s0, 4  ;;  %s589_s1 = int_to_ptr.vmem [resolvable:$true] %s588_s1 }
  0x16   :  { %v63_v11 = vand.u32 4294901760, %v45_v8  ;;  %v151_v14 = vsub.f32 %v43_v3, %v57_v6  ;;  %s797_s27 = scalar_lea.vmem %s589_s1, 256  ;;  %p802_p9 = scmp.lt.s32.totalorder %s589_s1, %s589_s1 }
  0x17   :  { %v865_v9 = vpack.c.bf16 %v57_v6, %v54_v4  ;;  %v144_v13 = vsub.f32 %v42_v2, %v54_v4  ;;  %v158_v20 = vsub.f32 %v44_v7, %v60_v10  ;;  %p798_p8 = scmp.ne.s32.totalorder %s589_s1, %s797_s27  ;;  %p803_p10 = scmp.lt.s32.totalorder %s797_s27, %s797_s27 }
  0x18   :  { %v869_v12 = vpack.c.bf16 %v63_v11, %v60_v10  ;;  %v152_v16 = vand.u32 4294901760, %v151_v14  ;;  %v165_v21 = vsub.f32 %v45_v8, %v63_v11 }
  0x19   :  { %34 = vperm.xlu0 %774, %v27_v5   ;;  %735 = vmatprep.subr.bf16.mxu0 %v865_v9  ;;  %v145_v15 = vand.u32 4294901760, %v144_v13  ;;  %v159_v24 = vand.u32 4294901760, %v158_v20  ;;  %v726_v33 = vpack.c.bf16 %v151_v14, %v144_v13  ;;  %p804_p11 = por %p803_p10, %p802_p9 }
  0x1a   :  { %711 = vmatprep.subr.bf16.mxu1 %v865_v9  ;;  %737 = vmatpush3.bf16.msra.mxu0 %v865_v9  ;;  %v153_v19 = vsub.f32 %v151_v14, %v152_v16  ;;  %v166_v25 = vand.u32 4294901760, %v165_v21  ;;  %v730_v34 = vpack.c.bf16 %v165_v21, %v158_v20 }
  0x1b   :  { %713 = vmatpush3.bf16.msra.mxu1 %v865_v9  ;;  %739 = vmatprep.subr.bf16.mxu0 %v869_v12  ;;  %v742_v17 = vpack.c.bf16 %v152_v16, %v145_v15  ;;  %v146_v18 = vsub.f32 %v144_v13, %v145_v15  ;;  %v160_v28 = vsub.f32 %v158_v20, %v159_v24  ;;  %p805_p12 = pnand %p804_p11, %p798_p8 }
  0x1c   :  { %715 = vmatprep.subr.bf16.mxu1 %v869_v12  ;;  %v154_v23 = vand.u32 4294901760, %v153_v19  ;;  %v746_v27 = vpack.c.bf16 %v166_v25, %v159_v24  ;;  %v167_v29 = vsub.f32 %v165_v21, %v166_v25 }
  0x1d   :  { %v147_v22 = vand.u32 4294901760, %v146_v18  ;;  %v161_v30 = vand.u32 4294901760, %v160_v28 }
  0x1e   :  { %741 = vmatpush3.bf16.msra.mxu0 %v869_v12  ;;  %v168_v31 = vand.u32 4294901760, %v167_v29 }
  0x1f   :  { %717 = vmatpush3.bf16.msra.mxu1 %v869_v12  ;;  %743 = vmatprep.subr.bf16.mxu0 %v742_v17  ;;  %v718_v26 = vpack.c.bf16 %v154_v23, %v147_v22 }
  0x20   :  { %v722_v32 = vpack.c.bf16 %v168_v31, %v161_v30 }
  0x21   :  { %719 = vmatprep.subr.bf16.mxu1 %v718_v26 }
  0x94   :  { %v32_v37 = vpop.permute.xlu0 %31 }
  0x95   :  { %vm36_vm1 = vcmp.eq.s32.totalorder %v29_v36, %v32_v37 }
  0x96   :  { %v600_v39 = vsel %vm36_vm1, 1.0, %v827_v38 }
  0x97   :  { %v48_v40 = vsel %vm46_vm0, %v600_v39, 0 }
  0x98   :  { %v123_v41 = vsub.f32 %v48_v40, %v48_v40  ;;  %v35_v42 = vpop.permute.xlu0 %34 }
  0x99   :  { %vm37_vm2 = vcmp.eq.s32.totalorder %v29_v36, %v35_v42 }
  0x9a   :  { %v601_v43 = vsel %vm37_vm2, 1.0, %v827_v38  ;;  %v124_v44 = vand.u32 4294901760, %v123_v41 }
  0x9b   :  { %v51_v45 = vsel %vm46_vm0, %v601_v43, 0 }
  0x9c   :  { %v133_v46 = vsub.f32 %v51_v45, %v51_v45  ;;  %685 = vmatprep.mubr.f32.mxu0 %v124_v44  ;;  %v125_v47 = vsub.f32 %v123_v41, %v124_v44 }
  0x9e   :  { %v126_v48 = vand.u32 4294901760, %v125_v47  ;;  %v134_v49 = vand.u32 4294901760, %v133_v46 }
  0xa0   :  { %652 = vmatprep.mubr.f32.mxu1 %v126_v48  ;;  %686 = vmatmul.mubr.f32.vlgmr.msra.gmra.mrb[0].mxu0 %v134_v49  ;;  %v135_v50 = vsub.f32 %v133_v46, %v134_v49 }
  0xa1   :  { %745 = vmatpush3.bf16.msra.mxu0 %v742_v17  ;;  %696 = vmatprep.mubr.msk.f32.mxu0 %vm46_vm0, %v600_v39 }
  0xa2   :  { %v136_v51 = vand.u32 4294901760, %v135_v50  ;;  %747 = vmatprep.subr.bf16.mxu0 %v746_v27 }
  0xa4   :  { %653 = vmatmul.mubr.f32.vlgmr.msra.gmra.mrb[0].mxu1 %v136_v51 }
  0xa5   :  { %721 = vmatpush3.bf16.msra.mxu1 %v718_v26  ;;  %663 = vmatprep.mubr.msk.f32.mxu1 %vm46_vm0, %v600_v39 }
  0xa6   :  { %749 = vmatpush3.bf16.msra.mxu0 %v746_v27  ;;  %723 = vmatprep.subr.bf16.mxu1 %v722_v32 }
  0xa7   :  { %751 = vmatprep.subr.bf16.mxu0 %v865_v9 }
  0xa9   :  { %725 = vmatpush3.bf16.msra.mxu1 %v722_v32  ;;  %697 = vmatmul.mubr.msk.f32.vlgmr.msra.gmra.mrb[0].mxu0 %vm46_vm0, %v601_v43 }
  0xaa   :  { %753 = vmatpush3.bf16.msra.mxu0 %v865_v9  ;;  %707 = vmatprep.mubr.msk.f32.mxu0 %vm46_vm0, %v600_v39 }
  0xab   :  { %727 = vmatprep.subr.bf16.mxu1 %v726_v33  ;;  %755 = vmatprep.subr.bf16.mxu0 %v869_v12 }
  0xac   :  { %664 = vmatmul.mubr.msk.f32.vlgmr.msra.gmra.mrb[0].mxu1 %vm46_vm0, %v601_v43 }
  0xad   :  { %729 = vmatpush3.bf16.msra.mxu1 %v726_v33  ;;  %674 = vmatprep.mubr.f32.mxu1 %v123_v41 }
  0xae   :  { %757 = vmatpush3.bf16.msra.mxu0 %v869_v12  ;;  %731 = vmatprep.subr.bf16.mxu1 %v730_v34 }
  0xb1   :  { %733 = vmatpush3.bf16.msra.mxu1 %v730_v34  ;;  %708 = vmatmul.mubr.msk.f32.vlgmr.msra.gmra.mrb[0].mxu0 %vm46_vm0, %v601_v43 }
  0xb4   :  { %675 = vmatmul.mubr.f32.vlgmr.msra.gmra.mrb[0].mxu1 %v133_v46 }
 0x184   :  { %v709_v52 = vpop.f32.mrb[0].mxu0 }
 0x185   :  { %v571_v53 = vpop.f32.mrb[1].mxu0 }
 0x187   :  { %v676_v54 = vpop.f32.mrb[0].mxu1 }
 0x188   :  { %v758_v55 = vadd.f32 %v709_v52, %v676_v54  ;;  %v315_v56 = vpop.f32.mrb[1].mxu1 }
 0x189   :  { %v759_v57 = vadd.f32 %v571_v53, %v315_v56 }
 0x18a   :  { %582 = vst [vmem:[#allocation5 + $0x8] sm:$0xff] %v758_v55 }
 0x18b   :  { %581 = vst [vmem:[#allocation5] sm:$0xff] %v759_v57 }
 0x18c   :  { %808 = shalt.err (!%p805_p12)
}
 0x18d   :  { %s809_s30 = scalar_lea.hbm %s906_s2, 256 }
 0x18e   :  { %p810_p13 = scmp.ne.s32.totalorder %s906_s2, %s809_s30  ;;  %p813_p0 = scmp.lt.u32.totalorder %s809_s30, %s906_s2 }
 0x190   :  { %p815_p1 = pnand %p813_p0, %p810_p13 }
 0x192   :  { %818 = shalt.err (!%p815_p1)
}
 0x193   :  { %594 = dma.vmem_to_hbm [thread:$0]  %s589_s1, 256, %s906_s2, [#allocation4], %s824_s19, %s824_s19, %s825_s20  }
 0x194   :  { %821 = dma.done.wait [#allocation4], 256  }
 0x195   :  { %822 = vsyncadd [#allocation4], 4294967040 }
 0x196   :  { %598 = vsyncpa [#allocation3], 1 }
 0x197   :  { %599 = vsyncpa [#allocation4], 1 }

</bundles_post_ra>
